<compile_context>
chip_gen: v6e
topology: v6e:2x2x1
jax: 0.10.0
libtpu: 0.0.40
codegen_flags: <defaults>
</compile_context>

<pallas_src>
import functools

import jax
import jax.numpy as jnp
from jax.experimental import pallas as pl
from jax.experimental.pallas import tpu as pltpu


def _round_up(x: int, m: int) -> int:
    return ((x + m - 1) // m) * m


def _vmem_capacity_bytes() -> int:
    """Per-TensorCore VMEM capacity; conservative fallback (v7x) if the query is unavailable."""
    try:
        info = pltpu.get_tpu_info()
        cap = getattr(info, "vmem_capacity_bytes", None)
        if cap:
            return int(cap)
    except Exception:
        pass
    return 64 * 1024 * 1024


def _kd_kl_kernel(s_ref, t_ref, o_ref, acc_ref, *, inv_t: float, scale: float, batch: int):
    """One (tb, N) batch tile: accumulate sum_rows KL(q || p); finalize at the last step of this core."""
    c = pl.program_id(0)           # TensorCore split ('parallel')
    i = pl.program_id(1)           # batch-tile reduction step ('arbitrary')
    steps = pl.num_programs(1)

    @pl.when(i == 0)
    def _init():
        acc_ref[...] = jnp.zeros_like(acc_ref)

    tb = s_ref.shape[0]
    # f32 math regardless of input dtype; multiply by 1/T instead of dividing (VALU-friendly).
    s = s_ref[...].astype(jnp.float32) * inv_t
    t = t_ref[...].astype(jnp.float32) * inv_t

    # student log-sum-exp pieces (log_p is never materialized)
    s_shift = s - jnp.max(s, axis=-1, keepdims=True)
    s_lse = jnp.log(jnp.sum(jnp.exp(s_shift), axis=-1, keepdims=True))     # [tb, 1]

    # teacher: un-normalized softmax pieces; normalization folded in per row
    t_shift = t - jnp.max(t, axis=-1, keepdims=True)
    t_exp = jnp.exp(t_shift)
    t_sum = jnp.sum(t_exp, axis=-1, keepdims=True)                          # [tb, 1]

    # sum_i q_i (log q_i - log p_i) = inner / t_sum + s_lse - log(t_sum)   (per row)
    inner = jnp.sum(t_exp * (t_shift - s_shift), axis=-1, keepdims=True)    # [tb, 1]
    kl_rows = inner / t_sum + s_lse - jnp.log(t_sum)                        # [tb, 1]

    # Mask rows beyond the true batch size: covers the partial boundary tile (undefined VMEM rows
    # stay confined per-row and are selected away) and the clamped duplicate tile of the 2nd core.
    row_start = (c * steps + i) * tb
    row_ids = row_start + jax.lax.broadcasted_iota(jnp.int32, (tb, 1), 0)
    kl_rows = jnp.where(row_ids < batch, kl_rows, 0.0)

    acc_ref[...] += jnp.sum(kl_rows, axis=0, keepdims=True)

    @pl.when(i == steps - 1)
    def _finalize():
        o_ref[...] = acc_ref[...] * scale


def knowledge_distillation_kl_loss(student_scores, teacher_scores, temperature,
                                   *, max_rows_per_tile: int | None = None):
    """Pallas TPU implementation of KnowledgeDistillationKLLoss.forward.

    student_scores, teacher_scores: [B, N] float (f32 or bf16) logits, same shape.
    Returns a float32 scalar.
    """
    assert student_scores.shape == teacher_scores.shape
    assert student_scores.ndim == 2, "expected [batch, num_classes] logits"
    B, N = student_scores.shape
    T = float(temperature)

    itemsize = jnp.dtype(student_scores.dtype).itemsize
    n_lanes = _round_up(N, 128)                       # VMEM lane padding (accounting only; no HBM pad)
    sublane = max(8, 32 // itemsize)                  # 8 for f32, 16 for bf16

    # --- per-generation VMEM budget: v5e/v6e have 128 MiB physical, v7x only 64 MiB per TC ---
    vmem_cap = _vmem_capacity_bytes()
    vmem_limit = min((vmem_cap * 3) // 4, 96 * 1024 * 1024)
    budget = (vmem_limit * 3) // 4                    # headroom for compiler scratch
    # 2 inputs x 2 pipeline buffers of the input dtype + ~6 full-tile f32 compute temporaries
    per_row_bytes = n_lanes * (4 * itemsize + 6 * 4)
    max_rows = max(1, budget // per_row_bytes)
    max_rows = min(max_rows, 4096)                    # >= ~4 MiB of input per step for small vocabularies
    if max_rows_per_tile is not None:
        max_rows = min(max_rows, max_rows_per_tile)

    if B <= max(sublane, max_rows):
        tb = B                                        # whole batch in one tile (full-dim block is always legal)
    else:
        tb = max(sublane, (max_rows // sublane) * sublane)
        # TODO(synk): for very large vocabularies where even a sublane-high row block (plus f32
        # temporaries) exceeds VMEM, tile the class axis as a trailing 'arbitrary' grid dim with
        # an online logsumexp instead of requiring the full row in one block.

    num_tiles = pl.cdiv(B, tb)
    num_splits = 2 if num_tiles >= 2 else 1           # shard batch tiles across TCs (v7x); no-op on 1-TC chips
    steps_per_core = pl.cdiv(num_tiles, num_splits)

    def row_map(c, i):
        # Clamp so the duplicated step of the second core (odd tile counts) stays in bounds;
        # its rows are masked out inside the kernel.
        return (jnp.minimum(c * steps_per_core + i, num_tiles - 1), 0)

    kernel = functools.partial(_kd_kl_kernel, inv_t=1.0 / T, scale=(T * T) / float(B), batch=B)

    partials = pl.pallas_call(
        kernel,
        out_shape=jax.ShapeDtypeStruct((num_splits, 1), jnp.float32),
        grid=(num_splits, steps_per_core),
        in_specs=[
            pl.BlockSpec((tb, N), row_map),
            pl.BlockSpec((tb, N), row_map),
        ],
        out_specs=pl.BlockSpec((1, 1), lambda c, i: (c, 0)),
        scratch_shapes=[pltpu.VMEM((1, 1), jnp.float32)],
        compiler_params=pltpu.CompilerParams(
            dimension_semantics=("parallel", "arbitrary"),   # TC split / batch reduction
            vmem_limit_bytes=vmem_limit,
        ),
    )(student_scores, teacher_scores)
    return jnp.sum(partials)


def _reference(student_scores, teacher_scores, temperature):
    # Pure-JAX reference (mirrors the PyTorch module).
    T = float(temperature)
    q = jax.nn.softmax(teacher_scores.astype(jnp.float32) / T, axis=-1)
    log_p = jax.nn.log_softmax(student_scores.astype(jnp.float32) / T, axis=-1)
    kl = jnp.sum(q * (jnp.log(q) - log_p)) / student_scores.shape[0]
    return kl * T * T


if __name__ == "__main__":
    key = jax.random.PRNGKey(0)
    temperature = 4  # module __init__ arg

    k1, k2, k3, k4, k5, k6 = jax.random.split(key, 6)

    # primary small test consistent with the module: [batch=2, num_classes=32]
    student = jax.random.normal(k1, (2, 32), dtype=jnp.float32)
    teacher = jax.random.normal(k2, (2, 32), dtype=jnp.float32)
    loss = jax.block_until_ready(knowledge_distillation_kl_loss(student, teacher, temperature))
    ref = _reference(student, teacher, temperature)
    assert jnp.allclose(loss, ref, rtol=1e-4, atol=1e-5), (loss, ref)

    # non-128-multiple class count + multi-tile batch with a forced small tile: exercises
    # boundary blocks, in-kernel row masking, the 2-way core split and index-map clamping.
    student2 = jax.random.normal(k3, (300, 200), dtype=jnp.float32)
    teacher2 = jax.random.normal(k4, (300, 200), dtype=jnp.float32)
    loss2 = jax.block_until_ready(
        knowledge_distillation_kl_loss(student2, teacher2, temperature, max_rows_per_tile=64))
    ref2 = _reference(student2, teacher2, temperature)
    assert jnp.allclose(loss2, ref2, rtol=1e-4, atol=1e-5), (loss2, ref2)

    # bf16 logits stay bf16 in HBM (half the DMA bytes); upcast to f32 inside the kernel.
    student3 = jax.random.normal(k5, (20, 200), dtype=jnp.bfloat16)
    teacher3 = jax.random.normal(k6, (20, 200), dtype=jnp.bfloat16)
    loss3 = jax.block_until_ready(knowledge_distillation_kl_loss(student3, teacher3, temperature))
    ref3 = _reference(student3, teacher3, temperature)
    assert jnp.allclose(loss3, ref3, rtol=5e-3, atol=1e-4), (loss3, ref3)

    print("KERNEL_OK")
</pallas_src>

<mosaic_0001>
module attributes {stable_mosaic.version = 11 : i64} {
  func.func @_kd_kl_kernel(%arg0: i32, %arg1: i32, %arg2: memref<2x32xf32, #tpu.memory_space<vmem>>, %arg3: memref<2x32xf32, #tpu.memory_space<vmem>>, %arg4: memref<1x1xf32, #tpu.memory_space<vmem>>, %arg5: memref<1x1xf32, #tpu.memory_space<vmem>>) attributes {dimension_semantics = [#tpu.dimension_semantics<parallel>, #tpu.dimension_semantics<arbitrary>], iteration_bounds = array<i64: 1, 1>, scalar_prefetch = 0 : i64, scratch_operands = 1 : i64, tpu.core_type = #tpu.core_type<tc>, window_params = [{transform_indices = @transform_0, window_bounds = array<i64: 2, 32>}, {transform_indices = @transform_1, window_bounds = array<i64: 2, 32>}, {transform_indices = @transform_2, window_bounds = array<i64: 1, 1>}]} {
    %c0_i32 = arith.constant 0 : i32
    %0 = arith.cmpi eq, %arg1, %c0_i32 : i32
    %1 = arith.extui %0 : i1 to i32
    %c0_i32_0 = arith.constant 0 : i32
    %2 = arith.cmpi ne, %1, %c0_i32_0 : i32
    scf.if %2 {
      %cst_19 = arith.constant 0.000000e+00 : f32
      %50 = vector.broadcast %cst_19 : f32 to vector<1x1xf32>
      %c0_20 = arith.constant 0 : index
      %c0_21 = arith.constant 0 : index
      %51 = vector.load %arg5[%c0_20, %c0_21] : memref<1x1xf32, #tpu.memory_space<vmem>>, vector<1x1xf32>
      tpu.vector_store %arg5[%c0_20, %c0_21], %50 {strides = array<i32>} : memref<1x1xf32, #tpu.memory_space<vmem>>, vector<1x1xf32>,
    } else {
    }
    %c0 = arith.constant 0 : index
    %c0_1 = arith.constant 0 : index
    %3 = vector.load %arg2[%c0, %c0_1] : memref<2x32xf32, #tpu.memory_space<vmem>>, vector<2x32xf32>
    %cst = arith.constant 2.500000e-01 : f32
    %4 = vector.broadcast %cst : f32 to vector<2x32xf32>
    %5 = arith.mulf %3, %4 : vector<2x32xf32>
    %c0_2 = arith.constant 0 : index
    %c0_3 = arith.constant 0 : index
    %6 = vector.load %arg3[%c0_2, %c0_3] : memref<2x32xf32, #tpu.memory_space<vmem>>, vector<2x32xf32>
    %cst_4 = arith.constant 2.500000e-01 : f32
    %7 = vector.broadcast %cst_4 : f32 to vector<2x32xf32>
    %8 = arith.mulf %6, %7 : vector<2x32xf32>
    %cst_5 = arith.constant dense<0xFF800000> : vector<2xf32>
    %9 = vector.multi_reduction <maximumf>, %5, %cst_5 [1] : vector<2x32xf32> to vector<2xf32>
    %10 = vector.shape_cast %9 : vector<2xf32> to vector<2x1xf32>
    %11 = vector.broadcast %10 : vector<2x1xf32> to vector<2x32xf32>
    %12 = arith.subf %5, %11 : vector<2x32xf32>
    %13 = math.exp %12 : vector<2x32xf32>
    %cst_6 = arith.constant dense<0.000000e+00> : vector<2xf32>
    %14 = vector.multi_reduction <add>, %13, %cst_6 [1] : vector<2x32xf32> to vector<2xf32>
    %15 = vector.shape_cast %14 : vector<2xf32> to vector<2x1xf32>
    %16 = math.log %15 : vector<2x1xf32>
    %cst_7 = arith.constant dense<0xFF800000> : vector<2xf32>
    %17 = vector.multi_reduction <maximumf>, %8, %cst_7 [1] : vector<2x32xf32> to vector<2xf32>
    %18 = vector.shape_cast %17 : vector<2xf32> to vector<2x1xf32>
    %19 = vector.broadcast %18 : vector<2x1xf32> to vector<2x32xf32>
    %20 = arith.subf %8, %19 : vector<2x32xf32>
    %21 = math.exp %20 : vector<2x32xf32>
    %cst_8 = arith.constant dense<0.000000e+00> : vector<2xf32>
    %22 = vector.multi_reduction <add>, %21, %cst_8 [1] : vector<2x32xf32> to vector<2xf32>
    %23 = vector.shape_cast %22 : vector<2xf32> to vector<2x1xf32>
    %24 = arith.subf %20, %12 : vector<2x32xf32>
    %25 = arith.mulf %21, %24 : vector<2x32xf32>
    %cst_9 = arith.constant dense<0.000000e+00> : vector<2xf32>
    %26 = vector.multi_reduction <add>, %25, %cst_9 [1] : vector<2x32xf32> to vector<2xf32>
    %27 = vector.shape_cast %26 : vector<2xf32> to vector<2x1xf32>
    %28 = arith.divf %27, %23 : vector<2x1xf32>
    %29 = arith.addf %28, %16 : vector<2x1xf32>
    %30 = math.log %23 : vector<2x1xf32>
    %31 = arith.subf %29, %30 : vector<2x1xf32>
    %c1_i32 = arith.constant 1 : i32
    %32 = arith.muli %arg0, %c1_i32 : i32
    %33 = arith.addi %32, %arg1 : i32
    %c2_i32 = arith.constant 2 : i32
    %34 = arith.muli %33, %c2_i32 : i32
    %35 = tpu.iota {dimensions = array<i32: 0>} : vector<2x1xi32>
    %36 = vector.broadcast %34 : i32 to vector<2x1xi32>
    %37 = arith.addi %36, %35 : vector<2x1xi32>
    %c2_i32_10 = arith.constant 2 : i32
    %38 = vector.broadcast %c2_i32_10 : i32 to vector<2x1xi32>
    %39 = arith.cmpi slt, %37, %38 : vector<2x1xi32>
    %cst_11 = arith.constant 0.000000e+00 : f32
    %40 = vector.broadcast %cst_11 : f32 to vector<2x1xf32>
    %41 = arith.select %39, %31, %40 : vector<2x1xi1>, vector<2x1xf32>
    %c0_12 = arith.constant 0 : index
    %c0_13 = arith.constant 0 : index
    %42 = vector.load %arg5[%c0_12, %c0_13] : memref<1x1xf32, #tpu.memory_space<vmem>>, vector<1x1xf32>
    %cst_14 = arith.constant dense<0.000000e+00> : vector<1xf32>
    %43 = vector.multi_reduction <add>, %41, %cst_14 [0] : vector<2x1xf32> to vector<1xf32>
    %44 = vector.shape_cast %43 : vector<1xf32> to vector<1x1xf32>
    %45 = arith.addf %42, %44 : vector<1x1xf32>
    %c0_15 = arith.constant 0 : index
    %c0_16 = arith.constant 0 : index
    %46 = vector.load %arg5[%c0_15, %c0_16] : memref<1x1xf32, #tpu.memory_space<vmem>>, vector<1x1xf32>
    tpu.vector_store %arg5[%c0_15, %c0_16], %45 {strides = array<i32>} : memref<1x1xf32, #tpu.memory_space<vmem>>, vector<1x1xf32>,
    %c0_i32_17 = arith.constant 0 : i32
    %47 = arith.cmpi eq, %arg1, %c0_i32_17 : i32
    %48 = arith.extui %47 : i1 to i32
    %c0_i32_18 = arith.constant 0 : i32
    %49 = arith.cmpi ne, %48, %c0_i32_18 : i32
    scf.if %49 {
      %c0_19 = arith.constant 0 : index
      %c0_20 = arith.constant 0 : index
      %50 = vector.load %arg5[%c0_19, %c0_20] : memref<1x1xf32, #tpu.memory_space<vmem>>, vector<1x1xf32>
      %cst_21 = arith.constant 8.000000e+00 : f32
      %51 = vector.broadcast %cst_21 : f32 to vector<1x1xf32>
      %52 = arith.mulf %50, %51 : vector<1x1xf32>
      %c0_22 = arith.constant 0 : index
      %c0_23 = arith.constant 0 : index
      %53 = vector.load %arg4[%c0_22, %c0_23] : memref<1x1xf32, #tpu.memory_space<vmem>>, vector<1x1xf32>
      tpu.vector_store %arg4[%c0_22, %c0_23], %52 {strides = array<i32>} : memref<1x1xf32, #tpu.memory_space<vmem>>, vector<1x1xf32>,
    } else {
    }
    return
  }
  func.func @transform_0(%arg0: i32, %arg1: i32) -> (i32, i32) {
    %c1_i32 = arith.constant 1 : i32
    %0 = arith.muli %arg0, %c1_i32 : i32
    %1 = arith.addi %0, %arg1 : i32
    %c0_i32 = arith.constant 0 : i32
    %2 = arith.minsi %1, %c0_i32 : i32
    %c0_i32_0 = arith.constant 0 : i32
    %c0_i32_1 = arith.constant 0 : i32
    return %2, %c0_i32_0 : i32, i32
  }
  func.func @transform_1(%arg0: i32, %arg1: i32) -> (i32, i32) {
    %c1_i32 = arith.constant 1 : i32
    %0 = arith.muli %arg0, %c1_i32 : i32
    %1 = arith.addi %0, %arg1 : i32
    %c0_i32 = arith.constant 0 : i32
    %2 = arith.minsi %1, %c0_i32 : i32
    %c0_i32_0 = arith.constant 0 : i32
    %c0_i32_1 = arith.constant 0 : i32
    return %2, %c0_i32_0 : i32, i32
  }
  func.func @transform_2(%arg0: i32, %arg1: i32) -> (i32, i32) {
    %c0_i32 = arith.constant 0 : i32
    %c0_i32_0 = arith.constant 0 : i32
    return %arg0, %c0_i32 : i32, i32
  }
}

</mosaic_0001>

<bundles_post_ra>
// kernel: tpu_custom_call.1
= control target key start
LH: loop header
LB: loop body
LE: loop exit
PB: predicated region body
PF: predicated region fallthrough
CT: control target
= control target key end

     0   :  { %7 = vsyncpa [#allocation4], 0  ;;  %s256_s0 = inlined_call_operand.hbm [shape: f32[2,32], index: 0, kind: input, shape index: {}]   ;;  %s257_s1 = inlined_call_operand.hbm [shape: f32[2,32], index: 1, kind: input, shape index: {}]   ;;  %s258_s2 = inlined_call_operand.hbm [shape: f32[1,1], index: 2, kind: output, shape index: {}]  }
   0x1   :  { %8 = vsyncpa [#allocation7], 0 }
   0x2   :  { %9 = vsyncpa [#allocation5], 0  ;;  %s220_s9 = smov [#allocation3]   ;;  %s221_s11 = smov [#allocation6]  }
   0x3   :  { %s21_s10 = sshll.u32 %s220_s9, 4  ;;  %s36_s12 = sshll.u32 %s221_s11, 4  ;;  %s22_s10 = int_to_ptr.vmem [resolvable:$true] %s21_s10  ;;  %s37_s12 = int_to_ptr.vmem [resolvable:$true] %s36_s12 }
   0x4   :  { %s162_s13 = scalar_lea.vmem %s22_s10, 32  ;;  %p167_p1 = scmp.lt.s32.totalorder %s22_s10, %s22_s10 }
   0x5   :  { %p163_p0 = scmp.ne.s32.totalorder %s22_s10, %s162_s13  ;;  %p168_p2 = scmp.lt.s32.totalorder %s162_s13, %s162_s13 }
   0x7   :  { %p169_p3 = por %p168_p2, %p167_p1 }
   0x9   :  { %p170_p4 = pnand %p169_p3, %p163_p0 }
   0xb   :  { %173 = shalt.err (!%p170_p4)
}
   0xc   :  { %24 = dma.hbm_to_vmem [thread:$0]  %s256_s0, 32, %s22_s10, [#allocation4]  }
   0xd   :  { %s182_s16 = scalar_lea.vmem %s37_s12, 32  ;;  %p187_p6 = scmp.lt.s32.totalorder %s37_s12, %s37_s12 }
   0xe   :  { %p183_p5 = scmp.ne.s32.totalorder %s37_s12, %s182_s16  ;;  %p188_p7 = scmp.lt.s32.totalorder %s182_s16, %s182_s16 }
  0x10   :  { %p189_p8 = por %p188_p7, %p187_p6 }
  0x12   :  { %p190_p9 = pnand %p189_p8, %p183_p5 }
  0x14   :  { %193 = shalt.err (!%p190_p9)
}
  0x15   :  { %39 = dma.hbm_to_vmem [thread:$0]  %s257_s1, 32, %s37_s12, [#allocation7]  }
  0x16   :  { %214 = dma.done.wait [#allocation4], 32  }
  0x17   :  { %215 = vsyncadd [#allocation4], 4294967264 }
  0x18   :  { %216 = dma.done.wait [#allocation7], 32  }
  0x19   :  { %217 = vsyncadd [#allocation7], 4294967264  ;;  %v58_v0 = vld [vmem:[#allocation3] sm:$0x3]  ;;  %vm62_vm0 = vcmask 254976   ;;  %vm56_vm1 = vcmask 0   ;;  %v96_v22 = vlaneseq }
  0x1a   :  { %v60_v1 = vld [vmem:[#allocation6] sm:$0x3]  ;;  %v59_v2 = vmul.f32 0.25, %v58_v0  ;;  %v222_v19 = vmov 0.0   ;;  %vm103_vm3 = vcmask 1041408   ;;  %s223_s0 = smov [#allocation8]  }
  0x1b   :  { %v61_v3 = vmul.f32 0.25, %v60_v1  ;;  %57 = vst.msk [vmem:[#allocation2] sm:$0x1] %vm56_vm1, %v222_v19  ;;  %v97_v25 = vshrl.u32 %v96_v22, 7  ;;  %s126_s1 = sshll.u32 %s223_s0, 4  ;;  %s127_s1 = int_to_ptr.vmem [resolvable:$true] %s126_s1 }
  0x1c   :  { %v63_v4 = vsel %vm62_vm0, %v59_v2, -inf  ;;  %s194_s19 = scalar_lea.vmem %s127_s1, 16  ;;  %s198_s20 = scalar_lea.vmem %s127_s1, 32 }
  0x1d   :  { %64 = vmax.xlane.f32.xlu0 %v63_v4  ;;  %v74_v5 = vsel %vm62_vm0, %v61_v3, -inf  ;;  %vm100_vm2 = vcmp.lt.s32.totalorder %v97_v25, 2  ;;  %p195_p10 = scmp.ne.s32.totalorder %s127_s1, %s194_s19  ;;  %p199_p11 = scmp.lt.s32.totalorder %s127_s1, %s127_s1 }
  0x1e   :  { %p200_p12 = scmp.lt.s32.totalorder %s198_s20, %s194_s19 }
  0x20   :  { %p201_p13 = por %p200_p12, %p199_p11 }
  0x21   :  { %75 = vmax.xlane.f32.xlu0 %v74_v5 }
  0x22   :  { %v102_v40 = vld [vmem:[#allocation2] sm:$0x1]  ;;  %p202_p0 = pnand %p201_p13, %p195_p10 }
  0xa6   :  { %v65_v6 = vpop.xlane.xlu0 %64 }
  0xa7   :  { %v66_v7 = vsub.f32 %v59_v2, %v65_v6 }
  0xa9   :  { %v67_v8 = vmul.f32 1.442695, %v66_v7 }
  0xaa   :  { %v76_v9 = vpop.xlane.xlu0 %75 }
  0xab   :  { %144 = vpow2.f32 %v67_v8  ;;  %v77_v10 = vsub.f32 %v61_v3, %v76_v9 }
  0xad   :  { %v78_v11 = vmul.f32 1.442695, %v77_v10  ;;  %v83_v14 = vsub.f32 %v77_v10, %v66_v7 }
  0xaf   :  { %146 = vpow2.f32 %v78_v11 }
  0xb8   :  { %v145_v12 = vpop.eup %144 }
  0xb9   :  { %v69_v13 = vsel %vm62_vm0, %v145_v12, 0.0 }
  0xba   :  { %70 = vadd.xlane.f32.xlu1 %v69_v13 }
  0xbc   :  { %v147_v15 = vpop.eup %146 }
  0xbd   :  { %v80_v16 = vsel %vm62_vm0, %v147_v15, 0.0  ;;  %v84_v17 = vmul.f32 %v147_v15, %v83_v14 }
  0xbe   :  { %81 = vadd.xlane.f32.xlu1 %v80_v16 }
  0xbf   :  { %v85_v18 = vsel %vm62_vm0, %v84_v17, 0.0 }
  0xc0   :  { %86 = vadd.xlane.f32.xlu0 %v85_v18 }
 0x143   :  { %v71_v20 = vpop.xlane.xlu1 %70 }
 0x144   :  { %148 = vlog2.f32 %v71_v20 }
 0x147   :  { %v82_v21 = vpop.xlane.xlu1 %81 }
 0x148   :  { %150 = vrcp.f32 %v82_v21 }
 0x149   :  { %152 = vlog2.f32 %v82_v21  ;;  %v87_v26 = vpop.xlane.xlu0 %86 }
 0x151   :  { %v149_v23 = vpop.eup %148 }
 0x152   :  { %v73_v28 = vmul.f32 0.6931472, %v149_v23 }
 0x155   :  { %v151_v24 = vpop.eup %150 }
 0x156   :  { %v153_v27 = vpop.eup %152  ;;  %v89_v29 = vmul.f32 %v151_v24, %v87_v26 }
 0x157   :  { %v92_v30 = vmul.f32 0.6931472, %v153_v27 }
 0x158   :  { %v90_v31 = vadd.f32 %v89_v29, %v73_v28 }
 0x15a   :  { %v93_v32 = vsub.f32 %v90_v31, %v92_v30 }
 0x15c   :  { %v101_v33 = vsel %vm100_vm2, %v93_v32, 0.0 }
 0x15d   :  { %v104_v34 = vsel %vm103_vm3, %v101_v33, 0.0 }
 0x15e   :  { %v105_v35 = vrot.slane %v104_v34, 4 }
 0x160   :  { %v106_v36 = vadd.f32 %v105_v35, %v104_v34 }
 0x162   :  { %v107_v37 = vrot.slane %v106_v36, 2 }
 0x164   :  { %v108_v38 = vadd.f32 %v107_v37, %v106_v36 }
 0x166   :  { %v109_v39 = vrot.slane %v108_v38, 1 }
 0x168   :  { %v110_v41 = vadd.f32 %v109_v39, %v108_v38 }
 0x16a   :  { %v111_v42 = vadd.f32 %v110_v41, %v102_v40 }
 0x16c   :  { %113 = vst.msk [vmem:[#allocation2] sm:$0x1] %vm56_vm1, %v111_v42 }
 0x173   :  { %v117_v43 = vld [vmem:[#allocation2] sm:$0x1] }
 0x174   :  { %v118_v44 = vmul.f32 8.0, %v117_v43 }
 0x176   :  { %119 = vst.msk [vmem:[#allocation8] sm:$0x1] %vm56_vm1, %v118_v44 }
 0x177   :  { %205 = shalt.err (!%p202_p0)
}
 0x178   :  { %129 = dma.vmem_to_hbm [thread:$0]  %s127_s1, 16, %s258_s2, [#allocation5]  }
 0x179   :  { %218 = dma.done.wait [#allocation5], 16  }
 0x17a   :  { %219 = vsyncadd [#allocation5], 4294967280 }
 0x17b   :  { %133 = vsyncpa [#allocation4], 1 }
 0x17c   :  { %134 = vsyncpa [#allocation7], 1 }
 0x17d   :  { %135 = vsyncpa [#allocation5], 1 }

</bundles_post_ra>
